<compile_context>
chip_gen: v7x
topology: tpu7x:2x2x1
jax: 0.10.0
libtpu: 0.0.40
codegen_flags: <defaults>
</compile_context>

<pallas_src>
import jax
import jax.numpy as jnp
from jax.experimental import pallas as pl
from jax.experimental.pallas import tpu as pltpu


def _neighbourhood_kernel(params_ref, x_ref, y_ref, out_ref):
    # params_ref: SMEM (3,) f32 = [winner_x_value, winner_y_value, -1/norm_const]
    wx = params_ref[0]
    wy = params_ref[1]
    neg_inv_norm = params_ref[2]

    dx = x_ref[...] - wx                    # VPU elementwise
    dy = y_ref[...] - wy
    d2 = dx * dx + dy * dy
    h = jnp.exp(d2 * neg_inv_norm)          # single EUP transcendental per element
    out_ref[...] = h.T                      # XLU tile transpose -> (tc, tr) block


def neighbourhood_forward(x, y, winner, t, *, sigma, max_iter, block=512):
    """x, y: (rows, cols) float32 SOM coordinate grids.
    winner: static (int, int) tuple (as produced by SOM.winner).
    t: int time step.
    Returns the (cols, rows) float32 array == (hx * hy).T of the reference.
    """
    assert block % 128 == 0, "block must be lane-aligned (multiple of 128)"
    R, C = x.shape

    # Decay.forward — scalar, host-side (sigma / t / max_iter are Python values).
    decay = sigma / (1.0 + t / (max_iter / 2.0))
    neg_inv_norm = -1.0 / (2.0 * decay * decay)

    wi, wj = winner
    # x.T[winner] == x[wj, wi]; static indices -> cheap static slice (no gather).
    wx = x[wj, wi]
    wy = y[wj, wi]
    params = jnp.stack([wx.astype(jnp.float32),
                        wy.astype(jnp.float32),
                        jnp.float32(neg_inv_norm)])

    # Full dim if it fits in one block, else a lane-aligned tile. A multiple of
    # 128 is legal both as the sublane dim of the input tile and as the lane dim
    # of the transposed output tile.
    tr = R if R <= block else block
    tc = C if C <= block else block
    grid = (pl.cdiv(R, tr), pl.cdiv(C, tc))

    # NOTE: tiny unaligned lattices (e.g. 16x16) still work but are dominated by
    # the fixed pallas_call launch overhead; plain XLA fusion is as fast there.
    out_shape = jax.ShapeDtypeStruct((C, R), jnp.float32)

    return pl.pallas_call(
        _neighbourhood_kernel,
        out_shape=out_shape,
        grid_spec=pltpu.PrefetchScalarGridSpec(
            num_scalar_prefetch=0,
            grid=grid,
            in_specs=[
                pl.BlockSpec(memory_space=pltpu.MemorySpace.SMEM),   # params (3,)
                pl.BlockSpec((tr, tc), lambda i, j: (i, j)),         # x tile
                pl.BlockSpec((tr, tc), lambda i, j: (i, j)),         # y tile
            ],
            # transpose folded into the index map: output block (tc, tr) at (j, i)
            out_specs=pl.BlockSpec((tc, tr), lambda i, j: (j, i)),
        ),
        compiler_params=pltpu.CompilerParams(
            dimension_semantics=("parallel", "parallel")),
    )(params, x, y)


def _reference(x, y, winner, t, *, sigma, max_iter):
    decay = sigma / (1.0 + t / (max_iter / 2.0))
    norm_const = 2.0 * decay * decay
    dx = jnp.square(x - x.T[winner])
    dy = jnp.square(y - y.T[winner])
    hx = jnp.exp(-(dx / norm_const))
    hy = jnp.exp(-(dy / norm_const))
    return (hx * hy).T


if __name__ == "__main__":
    # Lane-aligned SOM lattice so output stores are full-width vst (per review).
    ROWS, COLS = 128, 256
    SIGMA, MAX_ITER = 0.8, 100
    T = 5
    WINNER = (101, 37)   # (wi, wj): x.T[WINNER] == x[37, 101]

    key = jax.random.PRNGKey(0)
    kx, ky = jax.random.split(key)
    # Keep coordinate ranges moderate so the Gaussian has non-trivial spread.
    x = jax.random.uniform(kx, (ROWS, COLS), dtype=jnp.float32) * 4.0
    y = jax.random.uniform(ky, (ROWS, COLS), dtype=jnp.float32) * 4.0

    # block=128 -> (1, 2) grid: exercises the tiled, transposed-output path.
    out = neighbourhood_forward(x, y, WINNER, T, sigma=SIGMA, max_iter=MAX_ITER,
                                block=128)
    out = jax.block_until_ready(out)

    ref = _reference(x, y, WINNER, T, sigma=SIGMA, max_iter=MAX_ITER)
    assert out.shape == (COLS, ROWS)
    assert jnp.allclose(out, ref, atol=1e-6, rtol=1e-6)

    print("KERNEL_OK")
</pallas_src>

<mosaic_0001>
module attributes {stable_mosaic.version = 11 : i64} {
  func.func @_neighbourhood_kernel(%arg0: i32, %arg1: i32, %arg2: memref<3xf32, #tpu.memory_space<smem>>, %arg3: memref<128x128xf32, #tpu.memory_space<vmem>>, %arg4: memref<128x128xf32, #tpu.memory_space<vmem>>, %arg5: memref<128x128xf32, #tpu.memory_space<vmem>>) attributes {dimension_semantics = [#tpu.dimension_semantics<parallel>, #tpu.dimension_semantics<parallel>], iteration_bounds = array<i64: 1, 2>, scalar_prefetch = 0 : i64, scratch_operands = 0 : i64, tpu.core_type = #tpu.core_type<tc>, window_params = [{transform_indices = @transform_0, window_bounds = array<i64: 3>}, {transform_indices = @transform_1, window_bounds = array<i64: 128, 128>}, {transform_indices = @transform_2, window_bounds = array<i64: 128, 128>}, {transform_indices = @transform_3, window_bounds = array<i64: 128, 128>}]} {
    %c0 = arith.constant 0 : index
    %0 = memref.load %arg2[%c0] : memref<3xf32, #tpu.memory_space<smem>>
    %c1 = arith.constant 1 : index
    %1 = memref.load %arg2[%c1] : memref<3xf32, #tpu.memory_space<smem>>
    %c2 = arith.constant 2 : index
    %2 = memref.load %arg2[%c2] : memref<3xf32, #tpu.memory_space<smem>>
    %c0_0 = arith.constant 0 : index
    %c0_1 = arith.constant 0 : index
    %3 = vector.load %arg3[%c0_0, %c0_1] : memref<128x128xf32, #tpu.memory_space<vmem>>, vector<128x128xf32>
    %4 = vector.broadcast %0 : f32 to vector<128x128xf32>
    %5 = arith.subf %3, %4 : vector<128x128xf32>
    %c0_2 = arith.constant 0 : index
    %c0_3 = arith.constant 0 : index
    %6 = vector.load %arg4[%c0_2, %c0_3] : memref<128x128xf32, #tpu.memory_space<vmem>>, vector<128x128xf32>
    %7 = vector.broadcast %1 : f32 to vector<128x128xf32>
    %8 = arith.subf %6, %7 : vector<128x128xf32>
    %9 = arith.mulf %5, %5 : vector<128x128xf32>
    %10 = arith.mulf %8, %8 : vector<128x128xf32>
    %11 = arith.addf %9, %10 : vector<128x128xf32>
    %12 = vector.broadcast %2 : f32 to vector<128x128xf32>
    %13 = arith.mulf %11, %12 : vector<128x128xf32>
    %14 = math.exp %13 : vector<128x128xf32>
    %15 = tpu.transpose %14, [1, 0] : vector<128x128xf32> -> vector<128x128xf32>
    %c0_4 = arith.constant 0 : index
    %c0_5 = arith.constant 0 : index
    %16 = vector.load %arg5[%c0_4, %c0_5] : memref<128x128xf32, #tpu.memory_space<vmem>>, vector<128x128xf32>
    tpu.vector_store %arg5[%c0_4, %c0_5], %15 {strides = array<i32>} : memref<128x128xf32, #tpu.memory_space<vmem>>, vector<128x128xf32>,
    return
  }
  func.func @transform_0(%arg0: i32, %arg1: i32) -> i32 {
    %c0_i32 = arith.constant 0 : i32
    %c0_i32_0 = arith.constant 0 : i32
    return %c0_i32 : i32
  }
  func.func @transform_1(%arg0: i32, %arg1: i32) -> (i32, i32) {
    %c0_i32 = arith.constant 0 : i32
    return %arg0, %arg1 : i32, i32
  }
  func.func @transform_2(%arg0: i32, %arg1: i32) -> (i32, i32) {
    %c0_i32 = arith.constant 0 : i32
    return %arg0, %arg1 : i32, i32
  }
  func.func @transform_3(%arg0: i32, %arg1: i32) -> (i32, i32) {
    %c0_i32 = arith.constant 0 : i32
    return %arg1, %arg0 : i32, i32
  }
}

</mosaic_0001>

<bundles_post_ra>
// kernel: tpu_custom_call.1
= control target key start
LH: loop header
LB: loop body
LE: loop exit
PB: predicated region body
PF: predicated region fallthrough
CT: control target
= control target key end

     0   :  { %s1318_s0 = inlined_call_operand.hbm [shape: f32[3], index: 0, kind: input, shape index: {}]   ;;  %s1319_s1 = inlined_call_operand.hbm [shape: f32[128,256], index: 1, kind: input, shape index: {}]   ;;  %s1320_s2 = inlined_call_operand.hbm [shape: f32[128,256], index: 2, kind: input, shape index: {}]   ;;  %s1321_s3 = inlined_call_operand.hbm [shape: f32[256,128], index: 3, kind: output, shape index: {}]  }
   0x1   :  { %1327 = sst [smem:[#allocation15_spill]] %s1318_s0 }
   0x2   :  { %1328 = sst [smem:[#allocation16_spill]] %s1319_s1 }
   0x3   :  { %8 = vsyncpa [#allocation5], 0 }
   0x4   :  { %9 = vsyncpa [#allocation3], 0 }
   0x5   :  { %11 = vsyncpa [#allocation3 + $0x1], 0 }
   0x6   :  { %12 = vsyncpa [#allocation8], 0 }
   0x7   :  { %14 = vsyncpa [#allocation8 + $0x1], 0 }
   0x8   :  { %15 = vsyncpa [#allocation4], 0 }
   0x9   :  { %17 = vsyncpa [#allocation4 + $0x1], 0  ;;  %s948_s12 = smov 0   ;;  %s950_s13 = smov 0  }
   0xa   :  { %s952_s14 = smov 0   ;;  %s954_s15 = smov 0  }
   0xb   :  { %s956_s16 = smov 0   ;;  %s958_s17 = smov 0  }
   0xc LB: > { %s617_s18 = sadd.s32 4294967295, %s917_s17   ;;  %s618_s19 = sadd.s32 4294967294, %s917_s17   ;;  %s917_s17 = sphi %s958_s17, %s23_s17   ;;  %s913_s16 = sphi %s956_s16, %s1348_s16   ;;  %s909_s15 = sphi %s954_s15, %s1347_s15   ;;  %s905_s14 = sphi %s952_s14, %s1346_s14   ;;  %s901_s13 = sphi %s950_s13, %s1345_s13   ;;  %s897_s12 = sphi %s948_s12, %s1344_s12  }
   0xd   : > { %s65_s20 = sadd.s32 1, %s905_s14  ;;  %p72_p0 = scmp.ne.s32.totalorder %s905_s14, %s901_s13 }
   0xe   : > { %p73_p1 = scmp.eq.s32.totalorder %s917_s17, 0  ;;  %p78_p2 = scmp.ne.s32.totalorder %s901_s13, %s897_s12 }
   0xf   : > { %p986_p3 = scmp.eq.s32.totalorder %s617_s18, 0  ;;  %p132_p4 = scmp.eq.s32.totalorder %s617_s18, 1 }
  0x10   : > { %p74_p5 = por %p73_p1, %p72_p0  ;;  %p138_p6 = scmp.eq.s32.totalorder %s618_s19, 1 }
  0x11   : > { %s1329_s21 = scalar_select %p986_p3, 1, 0 }
  0x12   : > { %p992_p7 = por %p986_p3, %p78_p2  ;;  %p996_p8 = por %p132_p4, %p72_p0 }
  0x13   : > { %p1000_p9 = por %p138_p6, %p78_p2  ;;  %p619_p10 = scmp.ge.s32.totalorder %s917_s17, 1 }
  0x14   : > { %s1330_s22 = scalar_select %p992_p7, 1, 0 }
  0x15   : > { %s1331_s23 = scalar_select %p996_p8, 1, 0 }
  0x16   : > { %s1332_s24 = scalar_select %p1000_p9, 1, 0 }
  0x17   : > { %p145_p11 = scmp.lt.s32.totalorder %s917_s17, 3  ;;  %p665_p1 = scmp.lt.s32.totalorder %s917_s17, 2 }
  0x18   : > { %s1013_s26 = sand.u32 1, %s905_s14   ;;  %s32_s28 = sadd.s32 1, %s913_s16 }
  0x19   : > { %p1007_p13 = pnand %p619_p10, %p145_p11  ;;  %p1017_p4 = pnand %p665_p1, %p74_p5 }
  0x1a   : > { %s622_s29 = sshll.u32 %s1013_s26, 7  ;;  %p33_p6 = scmp.ge.s32.totalorder %s32_s28, 2 }
  0x1b   : > { %p649_p0 = pneg %p1007_p13  ;;  %s1335_s0 = sld [smem:[#allocation15_spill]] }
  0x1d   : > { %p650_p2 = pnand %p649_p0, %p986_p3 }
  0x1f   : > { %p756_p11 = pneg %p650_p2 }
  0x21   : > { %s754_s5 = scalar_lea.hbm %s1335_s0, 16 }
  0x22   : > { %p755_p10 = scmp.ne.s32.totalorder %s1335_s0, %s754_s5  ;;  %p761_p5 = scmp.lt.u32.totalorder %s754_s5, %s1335_s0 }
  0x24   : > { %p757_p12 = pnand %p756_p11, %p755_p10 }
  0x26   : > { %p758_p9 = pneg %p757_p12 }
  0x28   : > { %p763_p1 = pnand %p761_p5, %p758_p9 }
  0x2a   : > { %766 = shalt.err (!%p763_p1)
}
  0x2b   : > { %s919_s10 = smov [#allocation2]   ;;  %s1350_s28 = smov (%p33_p6, %s32_s28), 0 }
  0x2c   : > { %652 = dma.hbm_to_smem (!%p650_p2), %s1335_s0, 16, %s919_s10, [#allocation5]  }
  0x2d   : > { %1336 = sst [smem:[#allocation14_spill]] %s1350_s28  ;;  %s623_s19 = sshll.u32 %s913_s16, 7 }
  0x2e   : > { %s61_s30 = ssub.s32 %s913_s16, %s1350_s28  ;;  %s1337_s1 = sld [smem:[#allocation16_spill]] }
  0x2f   : > { %p63_p9 = scmp.eq.s32.totalorder %s61_s30, 0  ;;  %s171_s7 = scalar_lea.vmem [#allocation6], %s622_s29 }
  0x30   : > { %s180_s8 = sshll.u32 %s171_s7, 4  ;;  %s168_s10 = scalar_lea.sflag [#allocation3], %s1013_s26  ;;  %s1051_s8 = int_to_ptr.vmem [resolvable:$true] %s180_s8 }
  0x31   : > { %s1056_s9 = scalar_select %p63_p9, %s905_s14, %s65_s20  }
  0x32   : > { %p769_p0 = pneg %p1017_p4 }
  0x34   : > { %s1047_s6 = scalar_lea.hbm %s1337_s1, %s623_s19  ;;  %s772_s30 = scalar_lea.hbm %s1337_s1, 4096 }
  0x35   : > { %s767_s11 = scalar_lea.hbm %s1047_s6, 2048  ;;  %p773_p10 = scmp.lt.u32.totalorder %s1047_s6, %s1337_s1 }
  0x36   : > { %p768_p12 = scmp.ne.s32.totalorder %s1047_s6, %s767_s11  ;;  %p774_p11 = scmp.lt.u32.totalorder %s772_s30, %s767_s11 }
  0x37   : > { %p776_p1 = scmp.lt.u32.totalorder %s767_s11, %s1047_s6 }
  0x38   : > { %p770_p2 = pnand %p769_p0, %p768_p12  ;;  %p775_p5 = por %p774_p11, %p773_p10 }
  0x3a   : > { %p771_p6 = pneg %p770_p2  ;;  %p777_p9 = por %p776_p1, %p775_p5 }
  0x3c   : > { %p778_p8 = pnand %p777_p9, %p771_p6 }
  0x3e   : > { %781 = shalt.err (!%p778_p8)
}
  0x3f   : > { %s782_s20 = scalar_lea.vmem %s1051_s8, 2048  ;;  %s920_s18 = smov [#allocation6]  }
  0x40   : > { %p783_p12 = scmp.ne.s32.totalorder %s1051_s8, %s782_s20  ;;  %s787_s4 = sshll.u32 %s920_s18, 4  ;;  %s788_s4 = int_to_ptr.vmem [resolvable:$false] %s787_s4 }
  0x41   : > { %s789_s5 = scalar_lea.vmem %s788_s4, 4096  ;;  %p790_p3 = scmp.lt.s32.totalorder %s1051_s8, %s788_s4 }
  0x42   : > { %p785_p2 = pnand %p783_p12, %p769_p0  ;;  %p791_p10 = scmp.lt.s32.totalorder %s789_s5, %s782_s20 }
  0x44   : > { %p786_p7 = pneg %p785_p2  ;;  %p792_p11 = por %p791_p10, %p790_p3 }
  0x46   : > { %p793_p5 = pnand %p792_p11, %p786_p7 }
  0x48   : > { %796 = shalt.err (!%p793_p5)
}
  0x49   : > { %s921_s11 = smov 256   ;;  %s922_s30 = smov 128  }
  0x4a   : > { %s923_s7 = smov 8   ;;  %s1094_s4 = scalar_lea.hbm %s1320_s2, %s623_s19 }
  0x4b   : > { %656 = dma.hbm_to_vmem [thread:$0]  (!%p1017_p4), %s1047_s6, 2048, %s1051_s8, %s168_s10, %s921_s11, %s922_s30, %s923_s7  }
  0x4c   : > { %s194_s5 = scalar_lea.vmem [#allocation7], %s622_s29  ;;  %s191_s1 = scalar_lea.sflag [#allocation8], %s1013_s26 }
  0x4d   : > { %s203_s0 = sshll.u32 %s194_s5, 4  ;;  %s797_s28 = scalar_lea.hbm %s1094_s4, 2048  ;;  %s1098_s0 = int_to_ptr.vmem [resolvable:$true] %s203_s0 }
  0x4e   : > { %p798_p3 = scmp.ne.s32.totalorder %s1094_s4, %s797_s28  ;;  %s802_s19 = scalar_lea.hbm %s1320_s2, 4096 }
  0x4f   : > { %p803_p6 = scmp.lt.u32.totalorder %s1094_s4, %s1320_s2  ;;  %p804_p1 = scmp.lt.u32.totalorder %s802_s19, %s797_s28 }
  0x50   : > { %p800_p7 = pnand %p798_p3, %p769_p0  ;;  %p806_p12 = scmp.lt.u32.totalorder %s797_s28, %s1094_s4 }
  0x51   : > { %p805_p9 = por %p804_p1, %p803_p6 }
  0x52   : > { %p801_p8 = pneg %p800_p7 }
  0x53   : > { %p807_p2 = por %p806_p12, %p805_p9 }
  0x55   : > { %p808_p10 = pnand %p807_p2, %p801_p8 }
  0x57   : > { %811 = shalt.err (!%p808_p10)
}
  0x58   : > { %s812_s29 = scalar_lea.vmem %s1098_s0, 2048  ;;  %s924_s18 = smov [#allocation7]  }
  0x59   : > { %p813_p11 = scmp.ne.s32.totalorder %s1098_s0, %s812_s29  ;;  %s817_s5 = sshll.u32 %s924_s18, 4  ;;  %s818_s5 = int_to_ptr.vmem [resolvable:$false] %s817_s5 }
  0x5a   : > { %s819_s6 = scalar_lea.vmem %s818_s5, 4096  ;;  %p820_p7 = scmp.lt.s32.totalorder %s1098_s0, %s818_s5 }
  0x5b   : > { %p815_p5 = pnand %p813_p11, %p769_p0  ;;  %p821_p6 = scmp.lt.s32.totalorder %s819_s6, %s812_s29 }
  0x5d   : > { %p816_p3 = pneg %p815_p5  ;;  %p822_p1 = por %p821_p6, %p820_p7 }
  0x5f   : > { %p823_p9 = pnand %p822_p1, %p816_p3 }
  0x61   : > { %826 = shalt.err (!%p823_p9)
}
  0x62   : > { %659 = dma.hbm_to_vmem [thread:$0]  (!%p1017_p4), %s1094_s4, 2048, %s1098_s0, %s191_s1, %s921_s11, %s922_s30, %s923_s7  }
  0x63   : > { %215 = sbr.rel (%p1007_p13) target bundleno = 347 (0x15b), region = 32  ;;  %p1338_p0 = scmp.ne.s32.totalorder (!%p1007_p13), %s1329_s21, 0 }
  0x6a   : > { %880 = dma.done.wait (%p1338_p0), [#allocation5], 16  }
  0x6b   : > { %882 = vsyncadd (%p1338_p0), [#allocation5], 4294967280  ;;  %s1136_s27 = sand.u32 1, %s901_s13   ;;  %p1339_p4 = scmp.ne.s32.totalorder %s1330_s22, 0 }
  0x6c   : > { %s1139_s28 = sshll.u32 %s1136_s27, 7  ;;  %s222_s26 = scalar_lea.sflag [#allocation3], %s1136_s27 }
  0x6d   : > { %s1143_s0 = scalar_lea.vmem [#allocation6], %s1139_s28 }
  0x6e   : > { %884 = dma.done.wait (%p1339_p4), %s222_s26, 2048  }
  0x6f   : > { %886 = vsyncadd (%p1339_p4), %s222_s26, 4294965248  ;;  %s231_s1 = scalar_lea.sflag [#allocation8], %s1136_s27  ;;  %s1151_s21 = scalar_lea.vmem [#allocation7], %s1139_s28 }
  0x70   : > { %888 = dma.done.wait (%p1339_p4), %s231_s1, 2048  }
  0x71   : > { %890 = vsyncadd (%p1339_p4), %s231_s1, 4294965248 }
  0x72   : > { %239 = sfence }
  0x73   : > { %s266_s25 = sld [smem:[#allocation2]]  ;;  %s631_s11 = sld [smem:[#allocation2 + $0x1]]  ;;  %v269_v0 = vld [vmem:[%s1143_s0] sm:$0xff]  ;;  %v270_v2 = vld [vmem:[%s1143_s0 + $0x8] sm:$0xff]  ;;  %v271_v4 = vld [vmem:[%s1143_s0 + $0x10] sm:$0xff] }
  0x74   : > { %s632_s30 = sld [smem:[#allocation2 + $0x2]]  ;;  %v302_v1 = vld [vmem:[%s1151_s21] sm:$0xff]  ;;  %v303_v3 = vld [vmem:[%s1151_s21 + $0x8] sm:$0xff]  ;;  %v304_v5 = vld [vmem:[%s1151_s21 + $0x10] sm:$0xff]  ;;  %s1244_s22 = scalar_lea.vmem [#allocation9], %s1139_s28 }
  0x75   : > { %v272_v6 = vld [vmem:[%s1143_s0 + $0x18] sm:$0xff]  ;;  %v273_v18 = vld [vmem:[%s1143_s0 + $0x20] sm:$0xff]  ;;  %v274_v28 = vld [vmem:[%s1143_s0 + $0x28] sm:$0xff]  ;;  %s638_s7 = sshll.u32 %s909_s15, 11  ;;  %s495_s4 = sshll.u32 %s1244_s22, 4  ;;  %s1268_s4 = int_to_ptr.vmem [resolvable:$true] %s495_s4 }
  0x76   : > { %v305_v9 = vld [vmem:[%s1151_s21 + $0x18] sm:$0xff]  ;;  %v306_v19 = vld [vmem:[%s1151_s21 + $0x20] sm:$0xff]  ;;  %v307_v33 = vld [vmem:[%s1151_s21 + $0x28] sm:$0xff]  ;;  %s1266_s10 = scalar_lea.hbm %s1321_s3, %s638_s7  ;;  %s481_s20 = scalar_lea.sflag [#allocation4], %s1136_s27 }
  0x77   : > { %v275_v45 = vld [vmem:[%s1143_s0 + $0x30] sm:$0xff]  ;;  %v276_v55 = vld [vmem:[%s1143_s0 + $0x38] sm:$0xff]  ;;  %s827_s29 = scalar_lea.vmem %s1268_s4, 2048  ;;  %p1340_p8 = scmp.ne.s32.totalorder %s1331_s23, 0 }
  0x78   : > { %v308_v46 = vld [vmem:[%s1151_s21 + $0x30] sm:$0xff]  ;;  %v309_v56 = vld [vmem:[%s1151_s21 + $0x38] sm:$0xff]  ;;  %p828_p13 = scmp.ne.s32.totalorder %s1268_s4, %s827_s29  ;;  %s925_s15 = smov [#allocation9]  }
  0x79   : > { %v1164_v7 = vstv %s266_s25  ;;  %v1166_v8 = vstv %s631_s11  ;;  %s831_s18 = sshll.u32 %s925_s15, 4  ;;  %s832_s18 = int_to_ptr.vmem [resolvable:$false] %s831_s18 }
  0x7a   : > { %v286_v10 = vsub.f32 %v269_v0, %v1164_v7  ;;  %v319_v11 = vsub.f32 %v302_v1, %v1166_v8  ;;  %v1171_v12 = vstv %s632_s30  ;;  %v287_v13 = vsub.f32 %v270_v2, %v1164_v7  ;;  %v277_v0 = vld [vmem:[%s1143_s0 + $0x40] sm:$0xff]  ;;  %p829_p12 = pnand %p828_p13, %p1340_p8  ;;  %s833_s5 = scalar_lea.vmem %s832_s18, 4096 }
  0x7b   : > { %v320_v14 = vsub.f32 %v303_v3, %v1166_v8  ;;  %v288_v15 = vsub.f32 %v271_v4, %v1164_v7  ;;  %v321_v16 = vsub.f32 %v304_v5, %v1166_v8  ;;  %v289_v17 = vsub.f32 %v272_v6, %v1164_v7  ;;  %v310_v1 = vld [vmem:[%s1151_s21 + $0x40] sm:$0xff]  ;;  %p834_p10 = scmp.lt.s32.totalorder %s1268_s4, %s832_s18  ;;  %p835_p11 = scmp.lt.s32.totalorder %s833_s5, %s827_s29 }
  0x7c   : > { %v335_v20 = vmul.f32 %v286_v10, %v286_v10  ;;  %v351_v21 = vmul.f32 %v319_v11, %v319_v11  ;;  %v336_v22 = vmul.f32 %v287_v13, %v287_v13  ;;  %v322_v23 = vsub.f32 %v305_v9, %v1166_v8  ;;  %v278_v13 = vld [vmem:[%s1143_s0 + $0x48] sm:$0xff]  ;;  %p830_p2 = pneg %p829_p12 }
  0x7d   : > { %v352_v24 = vmul.f32 %v320_v14, %v320_v14  ;;  %v337_v25 = vmul.f32 %v288_v15, %v288_v15  ;;  %v353_v26 = vmul.f32 %v321_v16, %v321_v16  ;;  %v338_v27 = vmul.f32 %v289_v17, %v289_v17  ;;  %v311_v14 = vld [vmem:[%s1151_s21 + $0x48] sm:$0xff]  ;;  %p836_p5 = por %p835_p11, %p834_p10 }
  0x7e   : > { %v367_v29 = vadd.f32 %v351_v21, %v335_v20  ;;  %v354_v30 = vmul.f32 %v322_v23, %v322_v23  ;;  %v290_v31 = vsub.f32 %v273_v18, %v1164_v7  ;;  %v323_v32 = vsub.f32 %v306_v19, %v1166_v8  ;;  %v279_v23 = vld [vmem:[%s1143_s0 + $0x50] sm:$0xff] }
  0x7f   : > { %v368_v34 = vadd.f32 %v352_v24, %v336_v22  ;;  %v369_v35 = vadd.f32 %v353_v26, %v337_v25  ;;  %v291_v37 = vsub.f32 %v274_v28, %v1164_v7  ;;  %v324_v41 = vsub.f32 %v307_v33, %v1166_v8  ;;  %v312_v24 = vld [vmem:[%s1151_s21 + $0x50] sm:$0xff]  ;;  %v280_v33 = vld [vmem:[%s1143_s0 + $0x58] sm:$0xff]  ;;  %p837_p3 = pnand %p836_p5, %p830_p2 }
  0x80   : > { %v384_v36 = vmul.f32 %v1171_v12, %v367_v29  ;;  %v339_v39 = vmul.f32 %v290_v31, %v290_v31  ;;  %v355_v40 = vmul.f32 %v323_v32, %v323_v32  ;;  %v370_v44 = vadd.f32 %v354_v30, %v338_v27 }
  0x81   : > { %v385_v38 = vmul.f32 %v1171_v12, %v368_v34  ;;  %v386_v43 = vmul.f32 %v1171_v12, %v369_v35  ;;  %v340_v48 = vmul.f32 %v291_v37, %v291_v37  ;;  %v356_v50 = vmul.f32 %v324_v41, %v324_v41  ;;  %v313_v34 = vld [vmem:[%s1151_s21 + $0x58] sm:$0xff] }
  0x82   : > { %v400_v42 = vmul.f32 1.442695, %v384_v36  ;;  %v371_v49 = vadd.f32 %v355_v40, %v339_v39  ;;  %v292_v51 = vsub.f32 %v275_v45, %v1164_v7  ;;  %v325_v52 = vsub.f32 %v308_v46, %v1166_v8  ;;  %v314_v45 = vld [vmem:[%s1151_s21 + $0x60] sm:$0xff] }
  0x83   : > { %v402_v47 = vmul.f32 1.442695, %v385_v38  ;;  %v404_v53 = vmul.f32 1.442695, %v386_v43  ;;  %v387_v54 = vmul.f32 %v1171_v12, %v370_v44  ;;  %v372_v58 = vadd.f32 %v356_v50, %v340_v48  ;;  %v281_v43 = vld [vmem:[%s1143_s0 + $0x60] sm:$0xff] }
  0x84   : > { %722 = vpow2.f32 %v400_v42  ;;  %v388_v57 = vmul.f32 %v1171_v12, %v371_v49  ;;  %v341_v59 = vmul.f32 %v292_v51, %v292_v51  ;;  %v357_v60 = vmul.f32 %v325_v52, %v325_v52 }
  0x85   : > { %724 = vpow2.f32 %v402_v47  ;;  %v406_v61 = vmul.f32 1.442695, %v387_v54  ;;  %v293_v62 = vsub.f32 %v276_v55, %v1164_v7  ;;  %v326_v63 = vsub.f32 %v309_v56, %v1166_v8  ;;  %v315_v55 = vld [vmem:[%s1151_s21 + $0x68] sm:$0xff] }
  0x86   : > { %726 = vpow2.f32 %v404_v53  ;;  %v408_v2 = vmul.f32 1.442695, %v388_v57  ;;  %v389_v3 = vmul.f32 %v1171_v12, %v372_v58  ;;  %v373_v4 = vadd.f32 %v357_v60, %v341_v59  ;;  %v282_v53 = vld [vmem:[%s1143_s0 + $0x68] sm:$0xff] }
  0x87   : > { %v294_v5 = vsub.f32 %v277_v0, %v1164_v7  ;;  %728 = vpow2.f32 %v406_v61  ;;  %v342_v9 = vmul.f32 %v293_v62, %v293_v62  ;;  %v358_v10 = vmul.f32 %v326_v63, %v326_v63  ;;  %v283_v63 = vld [vmem:[%s1143_s0 + $0x70] sm:$0xff] }
  0x88   : > { %v327_v11 = vsub.f32 %v310_v1, %v1166_v8  ;;  %730 = vpow2.f32 %v408_v2  ;;  %v410_v16 = vmul.f32 1.442695, %v389_v3  ;;  %v390_v17 = vmul.f32 %v1171_v12, %v373_v4  ;;  %v316_v0 = vld [vmem:[%s1151_s21 + $0x70] sm:$0xff] }
  0x89   : > { %v343_v18 = vmul.f32 %v294_v5, %v294_v5  ;;  %v374_v19 = vadd.f32 %v358_v10, %v342_v9  ;;  %v295_v21 = vsub.f32 %v278_v13, %v1164_v7  ;;  %v328_v22 = vsub.f32 %v311_v14, %v1166_v8  ;;  %v317_v13 = vld [vmem:[%s1151_s21 + $0x78] sm:$0xff] }
  0x8a   : > { %v359_v20 = vmul.f32 %v327_v11, %v327_v11  ;;  %732 = vpow2.f32 %v410_v16  ;;  %v412_v26 = vmul.f32 1.442695, %v390_v17  ;;  %v296_v27 = vsub.f32 %v279_v23, %v1164_v7  ;;  %v284_v11 = vld [vmem:[%s1143_s0 + $0x78] sm:$0xff] }
  0x8b   : > { %v329_v28 = vsub.f32 %v312_v24, %v1166_v8  ;;  %v391_v29 = vmul.f32 %v1171_v12, %v374_v19  ;;  %v344_v31 = vmul.f32 %v295_v21, %v295_v21  ;;  %v360_v32 = vmul.f32 %v328_v22, %v328_v22 }
  0x8c   : > { %v375_v30 = vadd.f32 %v359_v20, %v343_v18  ;;  %v345_v36 = vmul.f32 %v296_v27, %v296_v27  ;;  %v297_v38 = vsub.f32 %v280_v33, %v1164_v7  ;;  %v330_v39 = vsub.f32 %v313_v34, %v1166_v8 }
  0x8d   : > { %v361_v37 = vmul.f32 %v329_v28, %v329_v28  ;;  %734 = vpow2.f32 %v412_v26  ;;  %v414_v40 = vmul.f32 1.442695, %v391_v29  ;;  %v376_v42 = vadd.f32 %v360_v32, %v344_v31 }
  0x8e   : > { %v723_v6 = vpop.eup %722  ;;  %v392_v41 = vmul.f32 %v1171_v12, %v375_v30  ;;  %v346_v47 = vmul.f32 %v297_v38, %v297_v38  ;;  %v362_v48 = vmul.f32 %v330_v39, %v330_v39  ;;  %v298_v49 = vsub.f32 %v281_v43, %v1164_v7 }
  0x8f   : > { %432 = vxpose.xlu0.b32.start [1/16] %v723_v6, 128  ;;  %v725_v15 = vpop.eup %724  ;;  %v377_v46 = vadd.f32 %v361_v37, %v345_v36  ;;  %736 = vpow2.f32 %v414_v40  ;;  %v393_v51 = vmul.f32 %v1171_v12, %v376_v42  ;;  %v331_v52 = vsub.f32 %v314_v45, %v1166_v8 }
  0x90   : > { %v727_v25 = vpop.eup %726  ;;  %v416_v50 = vmul.f32 1.442695, %v392_v41  ;;  %v378_v57 = vadd.f32 %v362_v48, %v346_v47  ;;  %v347_v58 = vmul.f32 %v298_v49, %v298_v49  ;;  %v299_v59 = vsub.f32 %v282_v53, %v1164_v7 }
  0x91   : > { %v729_v35 = vpop.eup %728  ;;  %v394_v56 = vmul.f32 %v1171_v12, %v377_v46  ;;  %v418_v60 = vmul.f32 1.442695, %v393_v51  ;;  %v363_v61 = vmul.f32 %v331_v52, %v331_v52  ;;  %v332_v62 = vsub.f32 %v315_v55, %v1166_v8 }
  0x92   : > { %v731_v44 = vpop.eup %730  ;;  %738 = vpow2.f32 %v416_v50  ;;  %v395_v3 = vmul.f32 %v1171_v12, %v378_v57  ;;  %v348_v4 = vmul.f32 %v299_v59, %v299_v59  ;;  %v300_v5 = vsub.f32 %v283_v63, %v1164_v7 }
  0x93   : > { %433 = vxpose.xlu0.b32.cont [2/16] %v725_v15, 128  ;;  %v420_v2 = vmul.f32 1.442695, %v394_v56  ;;  %740 = vpow2.f32 %v418_v60  ;;  %v379_v6 = vadd.f32 %v363_v61, %v347_v58  ;;  %v364_v9 = vmul.f32 %v332_v62, %v332_v62 }
  0x94   : > { %v733_v54 = vpop.eup %732  ;;  %v333_v10 = vsub.f32 %v316_v0, %v1166_v8  ;;  %v422_v15 = vmul.f32 1.442695, %v395_v3  ;;  %v349_v16 = vmul.f32 %v300_v5, %v300_v5  ;;  %v301_v17 = vsub.f32 %v284_v11, %v1164_v7 }
  0x95   : > { %742 = vpow2.f32 %v420_v2  ;;  %v396_v18 = vmul.f32 %v1171_v12, %v379_v6  ;;  %v380_v19 = vadd.f32 %v364_v9, %v348_v4  ;;  %v334_v21 = vsub.f32 %v317_v13, %v1166_v8 }
  0x96   : > { %v365_v20 = vmul.f32 %v333_v10, %v333_v10  ;;  %744 = vpow2.f32 %v422_v15  ;;  %v350_v23 = vmul.f32 %v301_v17, %v301_v17 }
  0x97   : > { %434 = vxpose.xlu0.b32.cont [3/16] %v727_v25, 128  ;;  %v735_v1 = vpop.eup %734  ;;  %v424_v24 = vmul.f32 1.442695, %v396_v18  ;;  %v397_v25 = vmul.f32 %v1171_v12, %v380_v19  ;;  %v366_v27 = vmul.f32 %v334_v21, %v334_v21 }
  0x98   : > { %v381_v26 = vadd.f32 %v365_v20, %v349_v16 }
  0x99   : > { %v737_v14 = vpop.eup %736  ;;  %746 = vpow2.f32 %v424_v24  ;;  %v426_v29 = vmul.f32 1.442695, %v397_v25  ;;  %v382_v30 = vadd.f32 %v366_v27, %v350_v23 }
  0x9a   : > { %v398_v7 = vmul.f32 %v1171_v12, %v381_v26 }
  0x9b   : > { %435 = vxpose.xlu0.b32.cont [4/16] %v729_v35, 128  ;;  %748 = vpow2.f32 %v426_v29  ;;  %v399_v32 = vmul.f32 %v1171_v12, %v382_v30 }
  0x9c   : > { %v739_v22 = vpop.eup %738  ;;  %v428_v8 = vmul.f32 1.442695, %v398_v7 }
  0x9d   : > { %v741_v28 = vpop.eup %740  ;;  %v430_v34 = vmul.f32 1.442695, %v399_v32 }
  0x9e   : > { %750 = vpow2.f32 %v428_v8 }
  0x9f   : > { %436 = vxpose.xlu0.b32.cont [5/16] %v731_v44, 128  ;;  %v743_v31 = vpop.eup %742  ;;  %752 = vpow2.f32 %v430_v34 }
  0xa0   : > { %v745_v33 = vpop.eup %744 }
  0xa3   : > { %437 = vxpose.xlu0.b32.cont [6/16] %v733_v54, 128  ;;  %v747_v35 = vpop.eup %746 }
  0xa5   : > { %v749_v36 = vpop.eup %748 }
  0xa7   : > { %438 = vxpose.xlu0.b32.cont [7/16] %v735_v1, 128 }
  0xa8   : > { %v751_v37 = vpop.eup %750 }
  0xa9   : > { %v753_v38 = vpop.eup %752 }
  0xab   : > { %439 = vxpose.xlu0.b32.cont [8/16] %v737_v14, 128 }
  0xaf   : > { %440 = vxpose.xlu0.b32.cont [9/16] %v739_v22, 128 }
  0xb3   : > { %441 = vxpose.xlu0.b32.cont [10/16] %v741_v28, 128 }
  0xb7   : > { %442 = vxpose.xlu0.b32.cont [11/16] %v743_v31, 128 }
  0xbb   : > { %443 = vxpose.xlu0.b32.cont [12/16] %v745_v33, 128 }
  0xbf   : > { %444 = vxpose.xlu0.b32.cont [13/16] %v747_v35, 128 }
  0xc3   : > { %445 = vxpose.xlu0.b32.cont [14/16] %v749_v36, 128 }
  0xc7   : > { %446 = vxpose.xlu0.b32.cont [15/16] %v751_v37, 128 }
  0xcb   : > { %447 = vxpose.xlu0.b32.end [16/16] %v753_v38, 128 }
 0x10f   : > { %v448_v39 = vpop.trf.xlu0 }
 0x110   : > { %464 = vst [vmem:[%s1244_s22] sm:$0xff] %v448_v39 }
 0x113   : > { %v449_v12 = vpop.trf.xlu0 }
 0x114   : > { %465 = vst [vmem:[%s1244_s22 + $0x8] sm:$0xff] %v449_v12 }
 0x117   : > { %v450_v40 = vpop.trf.xlu0 }
 0x118   : > { %466 = vst [vmem:[%s1244_s22 + $0x10] sm:$0xff] %v450_v40 }
 0x11b   : > { %v451_v41 = vpop.trf.xlu0 }
 0x11c   : > { %467 = vst [vmem:[%s1244_s22 + $0x18] sm:$0xff] %v451_v41 }
 0x11f   : > { %v452_v42 = vpop.trf.xlu0 }
 0x120   : > { %468 = vst [vmem:[%s1244_s22 + $0x20] sm:$0xff] %v452_v42 }
 0x123   : > { %v453_v43 = vpop.trf.xlu0 }
 0x124   : > { %469 = vst [vmem:[%s1244_s22 + $0x28] sm:$0xff] %v453_v43 }
 0x127   : > { %v454_v44 = vpop.trf.xlu0 }
 0x128   : > { %470 = vst [vmem:[%s1244_s22 + $0x30] sm:$0xff] %v454_v44 }
 0x12b   : > { %v455_v45 = vpop.trf.xlu0 }
 0x12c   : > { %471 = vst [vmem:[%s1244_s22 + $0x38] sm:$0xff] %v455_v45 }
 0x12f   : > { %v456_v46 = vpop.trf.xlu0 }
 0x130   : > { %472 = vst [vmem:[%s1244_s22 + $0x40] sm:$0xff] %v456_v46 }
 0x133   : > { %v457_v47 = vpop.trf.xlu0 }
 0x134   : > { %473 = vst [vmem:[%s1244_s22 + $0x48] sm:$0xff] %v457_v47 }
 0x137   : > { %v458_v48 = vpop.trf.xlu0 }
 0x138   : > { %474 = vst [vmem:[%s1244_s22 + $0x50] sm:$0xff] %v458_v48 }
 0x13b   : > { %v459_v49 = vpop.trf.xlu0 }
 0x13c   : > { %475 = vst [vmem:[%s1244_s22 + $0x58] sm:$0xff] %v459_v49 }
 0x13f   : > { %v460_v50 = vpop.trf.xlu0 }
 0x140   : > { %476 = vst [vmem:[%s1244_s22 + $0x60] sm:$0xff] %v460_v50 }
 0x143   : > { %v461_v51 = vpop.trf.xlu0 }
 0x144   : > { %477 = vst [vmem:[%s1244_s22 + $0x68] sm:$0xff] %v461_v51 }
 0x147   : > { %v462_v52 = vpop.trf.xlu0 }
 0x148   : > { %478 = vst [vmem:[%s1244_s22 + $0x70] sm:$0xff] %v462_v52 }
 0x14b   : > { %v463_v53 = vpop.trf.xlu0 }
 0x14c   : > { %479 = vst [vmem:[%s1244_s22 + $0x78] sm:$0xff] %v463_v53 }
 0x14d   : > { %840 = shalt.err (!%p837_p3)
}
 0x14e   : > { %s841_s6 = scalar_lea.hbm %s1266_s10, 2048  ;;  %s845_s0 = scalar_lea.hbm %s1321_s3, 4096 }
 0x14f   : > { %p842_p7 = scmp.ne.s32.totalorder %s1266_s10, %s841_s6  ;;  %p846_p9 = scmp.lt.u32.totalorder %s1266_s10, %s1321_s3 }
 0x150   : > { %p847_p0 = scmp.lt.u32.totalorder %s845_s0, %s841_s6  ;;  %p849_p13 = scmp.lt.u32.totalorder %s841_s6, %s1266_s10 }
 0x151   : > { %p843_p6 = pnand %p842_p7, %p1340_p8 }
 0x152   : > { %p848_p4 = por %p847_p0, %p846_p9 }
 0x153   : > { %p844_p1 = pneg %p843_p6 }
 0x154   : > { %p850_p12 = por %p849_p13, %p848_p4 }
 0x156   : > { %p851_p2 = pnand %p850_p12, %p844_p1 }
 0x158   : > { %854 = shalt.err (!%p851_p2)
}
 0x159   : > { %s926_s25 = smov 128   ;;  %s927_s11 = smov 8  }
 0x15a   : > { %647 = dma.vmem_to_hbm [thread:$0]  (%p1340_p8), %s1268_s4, 2048, %s1266_s10, %s481_s20, %s926_s25, %s926_s25, %s927_s11  }
 0x15b PF: > { %s510_s30 = sand.u32 1, %s897_s12   ;;  %p1341_p10 = scmp.ne.s32.totalorder %s1332_s24, 0 }
 0x15c   : > { %p1342_p11 = scmp.ge.s32.totalorder %s917_s17, 2  ;;  %s511_s22 = scalar_lea.sflag [#allocation4], %s510_s30 }
 0x15e   : > { %p661_p5 = pnand %p1342_p11, %p1341_p10 }
 0x160   : > { %892 = dma.done.wait (!%p661_p5), %s511_s22, 2048  }
 0x161   : > { %894 = vsyncadd (!%p661_p5), %s511_s22, 4294965248  ;;  %s23_s17 = sadd.s32 1, %s917_s17   ;;  %s1343_s23 = sld [smem:[#allocation14_spill]] }
 0x162   : > { %p20_p3 = scmp.ge.s32.totalorder %s23_s17, 4   ;;  %s1344_s12 = smov %s901_s13 }
 0x163   : > { %s1345_s13 = smov %s905_s14  ;;  %s1346_s14 = smov %s1056_s9 }
 0x164   : > { %s1347_s15 = smov %s913_s16  ;;  %22 = sbr.rel (!%p20_p3) target bundleno = 12 (0xc), region = 95 }
 0x167   : > { %s1348_s16 = smov %s1343_s23 }
 0x16b   :  { %516 = vsyncpa [#allocation3], 1 }
 0x16c   :  { %518 = vsyncpa [#allocation3 + $0x1], 1 }
 0x16d   :  { %519 = vsyncpa [#allocation8], 1 }
 0x16e   :  { %521 = vsyncpa [#allocation8 + $0x1], 1 }
 0x16f   :  { %522 = vsyncpa [#allocation4], 1 }
 0x170   :  { %524 = vsyncpa [#allocation4 + $0x1], 1 }
 0x171   :  { %525 = vsyncpa [#allocation5], 1 }
 0x172   :  { %527 = vsyncpa [#allocation5 + $0x1], 1 }

</bundles_post_ra>
